<compile_context>
chip_gen: v7x
topology: tpu7x:2x2x1
jax: 0.10.0
libtpu: 0.0.40
codegen_flags: <defaults>
</compile_context>

<pallas_src>
import jax
import jax.numpy as jnp
from jax.experimental import pallas as pl
from jax.experimental.pallas import tpu as pltpu

_LANE = 128      # lane width of a vreg (last dim)
_SUBLANE = 8     # sublane count (second-to-last dim)


def _round_up(n, m):
    return ((n + m - 1) // m) * m


def _cdiv(a, b):
    return -(-a // b)


# --------------------------------------------------------------------------
# Kernel
# --------------------------------------------------------------------------
def _make_mlp_kernel(n_hidden):
    """Kernel computing the full MLP for one batch tile, entirely in VMEM.

    Ref order: x, (w_i, b_i) for each hidden layer, w_last, scale, shift, out.
      hidden layers: h = relu6(h @ w + b)          (Dropout(eval) = identity)
      last layer   : y = (h @ w) * scale + shift   (Linear bias + BN folded)
    Weights may be bf16 (h is cast before the dot); accumulation and the
    bias / ReLU6 / scale-shift epilogue stay f32 on the VPU.
    """
    def kernel(x_ref, *refs):
        o_ref = refs[-1]
        h = x_ref[...]
        idx = 0
        for _ in range(n_hidden):
            w_ref, b_ref = refs[idx], refs[idx + 1]
            idx += 2
            h = jnp.dot(h.astype(w_ref.dtype), w_ref[...],
                        preferred_element_type=jnp.float32)
            h = jnp.clip(h + b_ref[...], 0.0, 6.0)           # ReLU6, f32
        w_ref, scale_ref, shift_ref = refs[idx], refs[idx + 1], refs[idx + 2]
        y = jnp.dot(h.astype(w_ref.dtype), w_ref[...],
                    preferred_element_type=jnp.float32)
        y = y * scale_ref[...] + shift_ref[...]               # bias + BN(eval)
        o_ref[...] = y.astype(o_ref.dtype)
    return kernel


# --------------------------------------------------------------------------
# Parameters
# --------------------------------------------------------------------------
def init_mlp_params(key, widths, bn=True, eps=1e-5):
    """Parameter init matching the PyTorch module's shapes (eval mode)."""
    params = []
    n_layers = len(widths) - 1
    for n in range(n_layers):
        din, dout = widths[n], widths[n + 1]
        key, kw, kb = jax.random.split(key, 3)
        bound = 1.0 / jnp.sqrt(jnp.float32(din))      # nn.Linear default range
        w = jax.random.uniform(kw, (din, dout), jnp.float32, -bound, bound)
        b = jax.random.uniform(kb, (1, dout), jnp.float32, -bound, bound)
        params.append((w, b))
    dlast = widths[-1]
    if bn:
        gamma = jnp.ones((1, dlast), jnp.float32)
        beta = jnp.zeros((1, dlast), jnp.float32)
        running_mean = jnp.zeros((1, dlast), jnp.float32)
        running_var = jnp.ones((1, dlast), jnp.float32)
        scale = gamma / jnp.sqrt(running_var + eps)
        shift = beta - running_mean * scale
    else:
        scale = jnp.ones((1, dlast), jnp.float32)
        shift = jnp.zeros((1, dlast), jnp.float32)
    return params, scale, shift


def prepare_padded_params(params, scale, shift, weights_dtype=jnp.float32):
    """Zero-pad feature dims to multiples of 128 lanes, optionally cast the
    weight matrices to bf16 (f32 accumulate in the kernel), and fold the last
    Linear bias into the BN shift.  Padded lanes are zero and stay zero
    through ReLU6 / the final affine (scale is zero-padded too)."""
    n_layers = len(params)
    n_hidden = n_layers - 1
    ops = []
    for n, (w, b) in enumerate(params):
        din, dout = w.shape
        din_p, dout_p = _round_up(din, _LANE), _round_up(dout, _LANE)
        w_p = (jnp.zeros((din_p, dout_p), jnp.float32).at[:din, :dout].set(w)
               .astype(weights_dtype))
        if n < n_hidden:
            b_p = jnp.zeros((1, dout_p), jnp.float32).at[:, :dout].set(b)
            ops += [w_p, b_p]
        else:
            scale_p = jnp.zeros((1, dout_p), jnp.float32).at[:, :dout].set(scale)
            shift_fused = b * scale + shift
            shift_p = jnp.zeros((1, dout_p), jnp.float32).at[:, :dout].set(shift_fused)
            ops += [w_p, scale_p, shift_p]
    return ops, n_hidden


# --------------------------------------------------------------------------
# VMEM limit sizing (generation-aware)
# --------------------------------------------------------------------------
def _vmem_limit_bytes(padded_ops, tm, din_p, dout_p, weight_buffers):
    weight_bytes = sum(int(op.size) * op.dtype.itemsize for op in padded_ops)
    max_w = max(int(op.shape[-1]) for op in padded_ops)
    io_bytes = 2 * tm * din_p * 4 + 2 * tm * dout_p * 4     # double-buffered x / y
    act_bytes = 4 * tm * max_w * 4                           # activation slack
    need = weight_buffers * weight_bytes + io_bytes + act_bytes
    need = int(need * 1.5) + (8 << 20)                       # headroom
    try:
        cap = int(pltpu.get_tpu_info().vmem_capacity_bytes)  # 64 MiB v7x, 128 MiB v5e/v6e
    except Exception:
        cap = 64 << 20                                        # conservative default
    return max(32 << 20, min(need, int(cap * 0.75)))


# --------------------------------------------------------------------------
# Forward
# --------------------------------------------------------------------------
def mlp_forward(x, padded_ops, n_hidden, out_features, *, tm_max=512):
    """x: [B, Din] f32 -> [B, out_features] f32 via one fused Pallas kernel."""
    B, din = x.shape
    din_p = padded_ops[0].shape[0]
    dout_p = padded_ops[-1].shape[1]

    # Batch tile: multiple of 8 sublanes, up to 512 rows.  If that would give a
    # single grid step but the batch can be split, split it so the "parallel"
    # axis can shard across both TensorCores on v7x.
    tm = min(tm_max, _round_up(max(B, 1), _SUBLANE))
    if _round_up(B, tm) // tm < 2 and B > _SUBLANE:
        tm = max(_SUBLANE, _round_up(_cdiv(B, 2), _SUBLANE))
    b_p = _round_up(B, tm)
    grid = (b_p // tm,)

    # Pad x only when needed (skip extra HBM round-trips for aligned shapes).
    if (b_p != B) or (din_p != din):
        x_p = jnp.zeros((b_p, din_p), x.dtype).at[:B, :din].set(x)
    else:
        x_p = x

    kernel = _make_mlp_kernel(n_hidden)

    flops = 2 * b_p * sum(int(op.shape[0]) * int(op.shape[1])
                          for op in padded_ops if op.ndim == 2 and op.shape[0] > 1)
    bytes_accessed = (x_p.size * x_p.dtype.itemsize
                      + b_p * dout_p * 4
                      + sum(int(op.size) * op.dtype.itemsize for op in padded_ops))
    cost = pl.CostEstimate(flops=flops, transcendentals=0,
                           bytes_accessed=bytes_accessed)

    def _run(buffered_weights):
        in_specs = [pl.BlockSpec((tm, din_p), lambda i: (i, 0))]
        for op in padded_ops:
            r, c = op.shape
            if buffered_weights:
                # Constant index_map -> no re-DMA across grid steps; a single
                # buffer halves resident-weight VMEM (biggest win on v7x).
                spec = pl.BlockSpec((r, c), lambda i: (0, 0),
                                    pipeline_mode=pl.Buffered(1))
            else:
                spec = pl.BlockSpec((r, c), lambda i: (0, 0))
            in_specs.append(spec)
        out_spec = pl.BlockSpec((tm, dout_p), lambda i: (i, 0))
        vmem_limit = _vmem_limit_bytes(padded_ops, tm, din_p, dout_p,
                                       weight_buffers=1 if buffered_weights else 2)
        y = pl.pallas_call(
            kernel,
            out_shape=jax.ShapeDtypeStruct((b_p, dout_p), jnp.float32),
            grid=grid,
            in_specs=in_specs,
            out_specs=out_spec,
            cost_estimate=cost,
            compiler_params=pltpu.CompilerParams(
                dimension_semantics=("parallel",),
                vmem_limit_bytes=vmem_limit,
            ),
        )(x_p, *padded_ops)
        return jax.block_until_ready(y)

    try:
        y_p = _run(buffered_weights=True)
    except Exception:
        # Older JAX without pipeline_mode / Buffered(1): default double-buffer.
        y_p = _run(buffered_weights=False)

    if (b_p != B) or (dout_p != out_features):
        return y_p[:B, :out_features]
    return y_p


# --------------------------------------------------------------------------
# Pure-JAX reference (eval-mode module)
# --------------------------------------------------------------------------
def mlp_reference(x, params, scale, shift):
    n_layers = len(params)
    for n, (w, b) in enumerate(params):
        y = x @ w + b
        if n < n_layers - 1:
            y = jnp.clip(y, 0.0, 6.0)
        else:
            y = y * scale + shift
        x = y
    return x


if __name__ == "__main__":
    widths = [16, 64, 32, 8]   # [in_channel, hidden..., out_channel]
    batch = 8

    key = jax.random.PRNGKey(0)
    key, kx = jax.random.split(key)
    x = jax.random.normal(kx, (batch, widths[0]), jnp.float32)

    params, scale, shift = init_mlp_params(key, widths, bn=True)
    ref = mlp_reference(x, params, scale, shift)

    # f32 weights: bit-tight check against the reference.
    padded_ops, n_hidden = prepare_padded_params(params, scale, shift,
                                                 weights_dtype=jnp.float32)
    out = mlp_forward(x, padded_ops, n_hidden, widths[-1])
    out = jax.block_until_ready(out)
    assert out.shape == (batch, widths[-1])
    assert jnp.allclose(out, ref, atol=1e-4, rtol=1e-4), "f32 mismatch vs reference"

    # bf16 weights (f32 accumulation): halves weight DMA/VMEM on v6e/v7x.
    padded_ops_bf16, _ = prepare_padded_params(params, scale, shift,
                                               weights_dtype=jnp.bfloat16)
    out_bf16 = mlp_forward(x, padded_ops_bf16, n_hidden, widths[-1])
    out_bf16 = jax.block_until_ready(out_bf16)
    assert out_bf16.shape == (batch, widths[-1])
    assert bool(jnp.all(jnp.isfinite(out_bf16)))
    assert jnp.allclose(out_bf16, ref, atol=1e-1, rtol=1e-1), "bf16 mismatch vs reference"

    print("KERNEL_OK")
</pallas_src>

<mosaic_0001>
module attributes {stable_mosaic.version = 11 : i64} {
  func.func @kernel(%arg0: i32, %arg1: memref<8x128xf32, #tpu.memory_space<vmem>>, %arg2: memref<128x128xf32, #tpu.memory_space<vmem>>, %arg3: memref<1x128xf32, #tpu.memory_space<vmem>>, %arg4: memref<128x128xf32, #tpu.memory_space<vmem>>, %arg5: memref<1x128xf32, #tpu.memory_space<vmem>>, %arg6: memref<128x128xf32, #tpu.memory_space<vmem>>, %arg7: memref<1x128xf32, #tpu.memory_space<vmem>>, %arg8: memref<1x128xf32, #tpu.memory_space<vmem>>, %arg9: memref<8x128xf32, #tpu.memory_space<vmem>>) attributes {dimension_semantics = [#tpu.dimension_semantics<parallel>], iteration_bounds = array<i64: 1>, scalar_prefetch = 0 : i64, scratch_operands = 0 : i64, tpu.core_type = #tpu.core_type<tc>, window_params = [{transform_indices = @transform_0, window_bounds = array<i64: 8, 128>}, {pipeline_mode = #tpu.pipeline_mode<synchronous>, transform_indices = @transform_1, window_bounds = array<i64: 128, 128>}, {pipeline_mode = #tpu.pipeline_mode<synchronous>, transform_indices = @transform_2, window_bounds = array<i64: 1, 128>}, {pipeline_mode = #tpu.pipeline_mode<synchronous>, transform_indices = @transform_3, window_bounds = array<i64: 128, 128>}, {pipeline_mode = #tpu.pipeline_mode<synchronous>, transform_indices = @transform_4, window_bounds = array<i64: 1, 128>}, {pipeline_mode = #tpu.pipeline_mode<synchronous>, transform_indices = @transform_5, window_bounds = array<i64: 128, 128>}, {pipeline_mode = #tpu.pipeline_mode<synchronous>, transform_indices = @transform_6, window_bounds = array<i64: 1, 128>}, {pipeline_mode = #tpu.pipeline_mode<synchronous>, transform_indices = @transform_7, window_bounds = array<i64: 1, 128>}, {transform_indices = @transform_8, window_bounds = array<i64: 8, 128>}]} {
    %c0 = arith.constant 0 : index
    %c0_0 = arith.constant 0 : index
    %0 = vector.load %arg1[%c0, %c0_0] : memref<8x128xf32, #tpu.memory_space<vmem>>, vector<8x128xf32>
    %c0_1 = arith.constant 0 : index
    %c0_2 = arith.constant 0 : index
    %1 = vector.load %arg2[%c0_1, %c0_2] : memref<128x128xf32, #tpu.memory_space<vmem>>, vector<128x128xf32>
    %cst = arith.constant dense<0.000000e+00> : vector<8x128xf32>
    %2 = tpu.matmul %0, %1, %cst {dimension_numbers = #tpu.dot_dimension_numbers<[1], [0], [0], [1], [0, 0, 1, 1], [], []>} : vector<8x128xf32>, vector<128x128xf32>, vector<8x128xf32> -> vector<8x128xf32>
    %c0_3 = arith.constant 0 : index
    %c0_4 = arith.constant 0 : index
    %3 = vector.load %arg3[%c0_3, %c0_4] : memref<1x128xf32, #tpu.memory_space<vmem>>, vector<1x128xf32>
    %4 = vector.broadcast %3 : vector<1x128xf32> to vector<8x128xf32>
    %5 = arith.addf %2, %4 : vector<8x128xf32>
    %cst_5 = arith.constant 0.000000e+00 : f32
    %cst_6 = arith.constant 6.000000e+00 : f32
    %6 = vector.broadcast %cst_5 : f32 to vector<8x128xf32>
    %7 = arith.maximumf %6, %5 : vector<8x128xf32>
    %8 = vector.broadcast %cst_6 : f32 to vector<8x128xf32>
    %9 = arith.minimumf %8, %7 : vector<8x128xf32>
    %c0_7 = arith.constant 0 : index
    %c0_8 = arith.constant 0 : index
    %10 = vector.load %arg4[%c0_7, %c0_8] : memref<128x128xf32, #tpu.memory_space<vmem>>, vector<128x128xf32>
    %cst_9 = arith.constant dense<0.000000e+00> : vector<8x128xf32>
    %11 = tpu.matmul %9, %10, %cst_9 {dimension_numbers = #tpu.dot_dimension_numbers<[1], [0], [0], [1], [0, 0, 1, 1], [], []>} : vector<8x128xf32>, vector<128x128xf32>, vector<8x128xf32> -> vector<8x128xf32>
    %c0_10 = arith.constant 0 : index
    %c0_11 = arith.constant 0 : index
    %12 = vector.load %arg5[%c0_10, %c0_11] : memref<1x128xf32, #tpu.memory_space<vmem>>, vector<1x128xf32>
    %13 = vector.broadcast %12 : vector<1x128xf32> to vector<8x128xf32>
    %14 = arith.addf %11, %13 : vector<8x128xf32>
    %cst_12 = arith.constant 0.000000e+00 : f32
    %cst_13 = arith.constant 6.000000e+00 : f32
    %15 = vector.broadcast %cst_12 : f32 to vector<8x128xf32>
    %16 = arith.maximumf %15, %14 : vector<8x128xf32>
    %17 = vector.broadcast %cst_13 : f32 to vector<8x128xf32>
    %18 = arith.minimumf %17, %16 : vector<8x128xf32>
    %c0_14 = arith.constant 0 : index
    %c0_15 = arith.constant 0 : index
    %19 = vector.load %arg6[%c0_14, %c0_15] : memref<128x128xf32, #tpu.memory_space<vmem>>, vector<128x128xf32>
    %cst_16 = arith.constant dense<0.000000e+00> : vector<8x128xf32>
    %20 = tpu.matmul %18, %19, %cst_16 {dimension_numbers = #tpu.dot_dimension_numbers<[1], [0], [0], [1], [0, 0, 1, 1], [], []>} : vector<8x128xf32>, vector<128x128xf32>, vector<8x128xf32> -> vector<8x128xf32>
    %c0_17 = arith.constant 0 : index
    %c0_18 = arith.constant 0 : index
    %21 = vector.load %arg7[%c0_17, %c0_18] : memref<1x128xf32, #tpu.memory_space<vmem>>, vector<1x128xf32>
    %22 = vector.broadcast %21 : vector<1x128xf32> to vector<8x128xf32>
    %23 = arith.mulf %20, %22 : vector<8x128xf32>
    %c0_19 = arith.constant 0 : index
    %c0_20 = arith.constant 0 : index
    %24 = vector.load %arg8[%c0_19, %c0_20] : memref<1x128xf32, #tpu.memory_space<vmem>>, vector<1x128xf32>
    %25 = vector.broadcast %24 : vector<1x128xf32> to vector<8x128xf32>
    %26 = arith.addf %23, %25 : vector<8x128xf32>
    %c0_21 = arith.constant 0 : index
    %c0_22 = arith.constant 0 : index
    %27 = vector.load %arg9[%c0_21, %c0_22] : memref<8x128xf32, #tpu.memory_space<vmem>>, vector<8x128xf32>
    tpu.vector_store %arg9[%c0_21, %c0_22], %26 {strides = array<i32>} : memref<8x128xf32, #tpu.memory_space<vmem>>, vector<8x128xf32>,
    return
  }
  func.func @transform_0(%arg0: i32) -> (i32, i32) {
    %c0_i32 = arith.constant 0 : i32
    %c0_i32_0 = arith.constant 0 : i32
    return %arg0, %c0_i32 : i32, i32
  }
  func.func @transform_1(%arg0: i32) -> (i32, i32) {
    %c0_i32 = arith.constant 0 : i32
    %c0_i32_0 = arith.constant 0 : i32
    %c0_i32_1 = arith.constant 0 : i32
    return %c0_i32, %c0_i32_0 : i32, i32
  }
  func.func @transform_2(%arg0: i32) -> (i32, i32) {
    %c0_i32 = arith.constant 0 : i32
    %c0_i32_0 = arith.constant 0 : i32
    %c0_i32_1 = arith.constant 0 : i32
    return %c0_i32, %c0_i32_0 : i32, i32
  }
  func.func @transform_3(%arg0: i32) -> (i32, i32) {
    %c0_i32 = arith.constant 0 : i32
    %c0_i32_0 = arith.constant 0 : i32
    %c0_i32_1 = arith.constant 0 : i32
    return %c0_i32, %c0_i32_0 : i32, i32
  }
  func.func @transform_4(%arg0: i32) -> (i32, i32) {
    %c0_i32 = arith.constant 0 : i32
    %c0_i32_0 = arith.constant 0 : i32
    %c0_i32_1 = arith.constant 0 : i32
    return %c0_i32, %c0_i32_0 : i32, i32
  }
  func.func @transform_5(%arg0: i32) -> (i32, i32) {
    %c0_i32 = arith.constant 0 : i32
    %c0_i32_0 = arith.constant 0 : i32
    %c0_i32_1 = arith.constant 0 : i32
    return %c0_i32, %c0_i32_0 : i32, i32
  }
  func.func @transform_6(%arg0: i32) -> (i32, i32) {
    %c0_i32 = arith.constant 0 : i32
    %c0_i32_0 = arith.constant 0 : i32
    %c0_i32_1 = arith.constant 0 : i32
    return %c0_i32, %c0_i32_0 : i32, i32
  }
  func.func @transform_7(%arg0: i32) -> (i32, i32) {
    %c0_i32 = arith.constant 0 : i32
    %c0_i32_0 = arith.constant 0 : i32
    %c0_i32_1 = arith.constant 0 : i32
    return %c0_i32, %c0_i32_0 : i32, i32
  }
  func.func @transform_8(%arg0: i32) -> (i32, i32) {
    %c0_i32 = arith.constant 0 : i32
    %c0_i32_0 = arith.constant 0 : i32
    return %arg0, %c0_i32 : i32, i32
  }
}

module attributes {stable_mosaic.version = 11 : i64} {
  func.func @kernel(%arg0: i32, %arg1: memref<8x128xf32, #tpu.memory_space<vmem>>, %arg2: memref<128x128xf32, #tpu.memory_space<vmem>>, %arg3: memref<1x128xf32, #tpu.memory_space<vmem>>, %arg4: memref<128x128xf32, #tpu.memory_space<vmem>>, %arg5: memref<1x128xf32, #tpu.memory_space<vmem>>, %arg6: memref<128x128xf32, #tpu.memory_space<vmem>>, %arg7: memref<1x128xf32, #tpu.memory_space<vmem>>, %arg8: memref<1x128xf32, #tpu.memory_space<vmem>>, %arg9: memref<8x128xf32, #tpu.memory_space<vmem>>) attributes {dimension_semantics = [#tpu.dimension_semantics<parallel>], iteration_bounds = array<i64: 1>, scalar_prefetch = 0 : i64, scratch_operands = 0 : i64, tpu.core_type = #tpu.core_type<tc>, window_params = [{transform_indices = @transform_0, window_bounds = array<i64: 8, 128>}, {pipeline_mode = #tpu.pipeline_mode<synchronous>, transform_indices = @transform_1, window_bounds = array<i64: 128, 128>}, {pipeline_mode = #tpu.pipeline_mode<synchronous>, transform_indices = @transform_2, window_bounds = array<i64: 1, 128>}, {pipeline_mode = #tpu.pipeline_mode<synchronous>, transform_indices = @transform_3, window_bounds = array<i64: 128, 128>}, {pipeline_mode = #tpu.pipeline_mode<synchronous>, transform_indices = @transform_4, window_bounds = array<i64: 1, 128>}, {pipeline_mode = #tpu.pipeline_mode<synchronous>, transform_indices = @transform_5, window_bounds = array<i64: 128, 128>}, {pipeline_mode = #tpu.pipeline_mode<synchronous>, transform_indices = @transform_6, window_bounds = array<i64: 1, 128>}, {pipeline_mode = #tpu.pipeline_mode<synchronous>, transform_indices = @transform_7, window_bounds = array<i64: 1, 128>}, {transform_indices = @transform_8, window_bounds = array<i64: 8, 128>}]} {
    %c0 = arith.constant 0 : index
    %c0_0 = arith.constant 0 : index
    %0 = vector.load %arg1[%c0, %c0_0] : memref<8x128xf32, #tpu.memory_space<vmem>>, vector<8x128xf32>
    %c0_1 = arith.constant 0 : index
    %c0_2 = arith.constant 0 : index
    %1 = vector.load %arg2[%c0_1, %c0_2] : memref<128x128xf32, #tpu.memory_space<vmem>>, vector<128x128xf32>
    %cst = arith.constant dense<0.000000e+00> : vector<8x128xf32>
    %2 = tpu.matmul %0, %1, %cst {dimension_numbers = #tpu.dot_dimension_numbers<[1], [0], [0], [1], [0, 0, 1, 1], [], []>} : vector<8x128xf32>, vector<128x128xf32>, vector<8x128xf32> -> vector<8x128xf32>
    %c0_3 = arith.constant 0 : index
    %c0_4 = arith.constant 0 : index
    %3 = vector.load %arg3[%c0_3, %c0_4] : memref<1x128xf32, #tpu.memory_space<vmem>>, vector<1x128xf32>
    %4 = vector.broadcast %3 : vector<1x128xf32> to vector<8x128xf32>
    %5 = arith.addf %2, %4 : vector<8x128xf32>
    %cst_5 = arith.constant 0.000000e+00 : f32
    %cst_6 = arith.constant 6.000000e+00 : f32
    %6 = vector.broadcast %cst_5 : f32 to vector<8x128xf32>
    %7 = arith.maximumf %6, %5 : vector<8x128xf32>
    %8 = vector.broadcast %cst_6 : f32 to vector<8x128xf32>
    %9 = arith.minimumf %8, %7 : vector<8x128xf32>
    %c0_7 = arith.constant 0 : index
    %c0_8 = arith.constant 0 : index
    %10 = vector.load %arg4[%c0_7, %c0_8] : memref<128x128xf32, #tpu.memory_space<vmem>>, vector<128x128xf32>
    %cst_9 = arith.constant dense<0.000000e+00> : vector<8x128xf32>
    %11 = tpu.matmul %9, %10, %cst_9 {dimension_numbers = #tpu.dot_dimension_numbers<[1], [0], [0], [1], [0, 0, 1, 1], [], []>} : vector<8x128xf32>, vector<128x128xf32>, vector<8x128xf32> -> vector<8x128xf32>
    %c0_10 = arith.constant 0 : index
    %c0_11 = arith.constant 0 : index
    %12 = vector.load %arg5[%c0_10, %c0_11] : memref<1x128xf32, #tpu.memory_space<vmem>>, vector<1x128xf32>
    %13 = vector.broadcast %12 : vector<1x128xf32> to vector<8x128xf32>
    %14 = arith.addf %11, %13 : vector<8x128xf32>
    %cst_12 = arith.constant 0.000000e+00 : f32
    %cst_13 = arith.constant 6.000000e+00 : f32
    %15 = vector.broadcast %cst_12 : f32 to vector<8x128xf32>
    %16 = arith.maximumf %15, %14 : vector<8x128xf32>
    %17 = vector.broadcast %cst_13 : f32 to vector<8x128xf32>
    %18 = arith.minimumf %17, %16 : vector<8x128xf32>
    %c0_14 = arith.constant 0 : index
    %c0_15 = arith.constant 0 : index
    %19 = vector.load %arg6[%c0_14, %c0_15] : memref<128x128xf32, #tpu.memory_space<vmem>>, vector<128x128xf32>
    %cst_16 = arith.constant dense<0.000000e+00> : vector<8x128xf32>
    %20 = tpu.matmul %18, %19, %cst_16 {dimension_numbers = #tpu.dot_dimension_numbers<[1], [0], [0], [1], [0, 0, 1, 1], [], []>} : vector<8x128xf32>, vector<128x128xf32>, vector<8x128xf32> -> vector<8x128xf32>
    %c0_17 = arith.constant 0 : index
    %c0_18 = arith.constant 0 : index
    %21 = vector.load %arg7[%c0_17, %c0_18] : memref<1x128xf32, #tpu.memory_space<vmem>>, vector<1x128xf32>
    %22 = vector.broadcast %21 : vector<1x128xf32> to vector<8x128xf32>
    %23 = arith.mulf %20, %22 : vector<8x128xf32>
    %c0_19 = arith.constant 0 : index
    %c0_20 = arith.constant 0 : index
    %24 = vector.load %arg8[%c0_19, %c0_20] : memref<1x128xf32, #tpu.memory_space<vmem>>, vector<1x128xf32>
    %25 = vector.broadcast %24 : vector<1x128xf32> to vector<8x128xf32>
    %26 = arith.addf %23, %25 : vector<8x128xf32>
    %c0_21 = arith.constant 0 : index
    %c0_22 = arith.constant 0 : index
    %27 = vector.load %arg9[%c0_21, %c0_22] : memref<8x128xf32, #tpu.memory_space<vmem>>, vector<8x128xf32>
    tpu.vector_store %arg9[%c0_21, %c0_22], %26 {strides = array<i32>} : memref<8x128xf32, #tpu.memory_space<vmem>>, vector<8x128xf32>,
    return
  }
  func.func @transform_0(%arg0: i32) -> (i32, i32) {
    %c0_i32 = arith.constant 0 : i32
    %c0_i32_0 = arith.constant 0 : i32
    return %arg0, %c0_i32 : i32, i32
  }
  func.func @transform_1(%arg0: i32) -> (i32, i32) {
    %c0_i32 = arith.constant 0 : i32
    %c0_i32_0 = arith.constant 0 : i32
    %c0_i32_1 = arith.constant 0 : i32
    return %c0_i32, %c0_i32_0 : i32, i32
  }
  func.func @transform_2(%arg0: i32) -> (i32, i32) {
    %c0_i32 = arith.constant 0 : i32
    %c0_i32_0 = arith.constant 0 : i32
    %c0_i32_1 = arith.constant 0 : i32
    return %c0_i32, %c0_i32_0 : i32, i32
  }
  func.func @transform_3(%arg0: i32) -> (i32, i32) {
    %c0_i32 = arith.constant 0 : i32
    %c0_i32_0 = arith.constant 0 : i32
    %c0_i32_1 = arith.constant 0 : i32
    return %c0_i32, %c0_i32_0 : i32, i32
  }
  func.func @transform_4(%arg0: i32) -> (i32, i32) {
    %c0_i32 = arith.constant 0 : i32
    %c0_i32_0 = arith.constant 0 : i32
    %c0_i32_1 = arith.constant 0 : i32
    return %c0_i32, %c0_i32_0 : i32, i32
  }
  func.func @transform_5(%arg0: i32) -> (i32, i32) {
    %c0_i32 = arith.constant 0 : i32
    %c0_i32_0 = arith.constant 0 : i32
    %c0_i32_1 = arith.constant 0 : i32
    return %c0_i32, %c0_i32_0 : i32, i32
  }
  func.func @transform_6(%arg0: i32) -> (i32, i32) {
    %c0_i32 = arith.constant 0 : i32
    %c0_i32_0 = arith.constant 0 : i32
    %c0_i32_1 = arith.constant 0 : i32
    return %c0_i32, %c0_i32_0 : i32, i32
  }
  func.func @transform_7(%arg0: i32) -> (i32, i32) {
    %c0_i32 = arith.constant 0 : i32
    %c0_i32_0 = arith.constant 0 : i32
    %c0_i32_1 = arith.constant 0 : i32
    return %c0_i32, %c0_i32_0 : i32, i32
  }
  func.func @transform_8(%arg0: i32) -> (i32, i32) {
    %c0_i32 = arith.constant 0 : i32
    %c0_i32_0 = arith.constant 0 : i32
    return %arg0, %c0_i32 : i32, i32
  }
}

</mosaic_0001>

<bundles_post_ra>
// kernel: tpu_custom_call.1
= control target key start
LH: loop header
LB: loop body
LE: loop exit
PB: predicated region body
PF: predicated region fallthrough
CT: control target
= control target key end

     0   :  { %13 = vsyncpa [#allocation3], 0  ;;  %s920_s0 = inlined_call_operand.hbm [shape: f32[8,128], index: 0, kind: input, shape index: {}]   ;;  %s921_s1 = inlined_call_operand.hbm [shape: f32[128,128], index: 1, kind: input, shape index: {}]   ;;  %s922_s2 = inlined_call_operand.vmem [shape: f32[1,128], index: 2, kind: input, shape index: {}]   ;;  %s923_s3 = inlined_call_operand.hbm [shape: f32[128,128], index: 3, kind: input, shape index: {}]   ;;  %s924_s4 = inlined_call_operand.vmem [shape: f32[1,128], index: 4, kind: input, shape index: {}]   ;;  %s925_s5 = inlined_call_operand.hbm [shape: f32[128,128], index: 5, kind: input, shape index: {}]   ;;  %s926_s6 = inlined_call_operand.vmem [shape: f32[1,128], index: 6, kind: input, shape index: {}]   ;;  %s927_s7 = inlined_call_operand.vmem [shape: f32[1,128], index: 7, kind: input, shape index: {}]   ;;  %s928_s8 = inlined_call_operand.hbm [shape: f32[8,128], index: 8, kind: output, shape index: {}]  }
   0x1   :  { %14 = vsyncpa [#allocation6], 0 }
   0x2   :  { %15 = vsyncpa [#allocation9], 0 }
   0x3   :  { %16 = vsyncpa [#allocation4], 0  ;;  %s754_s27 = smov [#allocation5]   ;;  %s636_s9 = scalar_lea.hbm %s921_s1, 2048 }
   0x4   :  { %s32_s28 = sshll.u32 %s754_s27, 4  ;;  %p637_p0 = scmp.ne.s32.totalorder %s921_s1, %s636_s9  ;;  %s33_s28 = int_to_ptr.vmem [resolvable:$true] %s32_s28 }
   0x5   :  { %p640_p1 = scmp.lt.u32.totalorder %s636_s9, %s921_s1 }
   0x7   :  { %p642_p2 = pnand %p640_p1, %p637_p0 }
   0x9   :  { %645 = shalt.err (!%p642_p2)
}
   0xa   :  { %s646_s14 = scalar_lea.vmem %s33_s28, 2048  ;;  %p651_p4 = scmp.lt.s32.totalorder %s33_s28, %s33_s28 }
   0xb   :  { %p647_p3 = scmp.ne.s32.totalorder %s33_s28, %s646_s14  ;;  %p652_p5 = scmp.lt.s32.totalorder %s646_s14, %s646_s14 }
   0xd   :  { %p653_p6 = por %p652_p5, %p651_p4 }
   0xf   :  { %p654_p7 = pnand %p653_p6, %p647_p3 }
  0x11   :  { %657 = shalt.err (!%p654_p7)
}
  0x12   :  { %s755_s15 = smov 128   ;;  %s756_s16 = smov 8  }
  0x13   :  { %38 = dma.hbm_to_vmem [thread:$0]  %s921_s1, 2048, %s33_s28, [#allocation6], %s755_s15, %s755_s15, %s756_s16  }
  0x14   :  { %s757_s19 = smov [#allocation2]   ;;  %s758_s21 = smov [#allocation7]  }
  0x15   :  { %s23_s20 = sshll.u32 %s757_s19, 4  ;;  %s46_s22 = sshll.u32 %s758_s21, 4  ;;  %s24_s20 = int_to_ptr.vmem [resolvable:$true] %s23_s20  ;;  %s47_s22 = int_to_ptr.vmem [resolvable:$true] %s46_s22 }
  0x16   :  { %s658_s25 = scalar_lea.hbm %s920_s0, 128 }
  0x17   :  { %p659_p8 = scmp.ne.s32.totalorder %s920_s0, %s658_s25  ;;  %p662_p9 = scmp.lt.u32.totalorder %s658_s25, %s920_s0 }
  0x19   :  { %p664_p10 = pnand %p662_p9, %p659_p8 }
  0x1b   :  { %667 = shalt.err (!%p664_p10)
}
  0x1c   :  { %s668_s1 = scalar_lea.vmem %s24_s20, 128  ;;  %p673_p12 = scmp.lt.s32.totalorder %s24_s20, %s24_s20 }
  0x1d   :  { %p669_p11 = scmp.ne.s32.totalorder %s24_s20, %s668_s1  ;;  %p674_p13 = scmp.lt.s32.totalorder %s668_s1, %s668_s1 }
  0x1f   :  { %p675_p0 = por %p674_p13, %p673_p12 }
  0x21   :  { %p676_p1 = pnand %p675_p0, %p669_p11 }
  0x23   :  { %679 = shalt.err (!%p676_p1)
}
  0x24   :  { %26 = dma.hbm_to_vmem [thread:$0]  %s920_s0, 128, %s24_s20, [#allocation3]  }
  0x25   :  { %s680_s12 = scalar_lea.hbm %s923_s3, 2048 }
  0x26   :  { %p681_p2 = scmp.ne.s32.totalorder %s923_s3, %s680_s12  ;;  %p684_p3 = scmp.lt.u32.totalorder %s680_s12, %s923_s3 }
  0x28   :  { %p686_p4 = pnand %p684_p3, %p681_p2 }
  0x2a   :  { %689 = shalt.err (!%p686_p4)
}
  0x2b   :  { %s690_s19 = scalar_lea.vmem %s47_s22, 2048  ;;  %p695_p6 = scmp.lt.s32.totalorder %s47_s22, %s47_s22 }
  0x2c   :  { %p691_p5 = scmp.ne.s32.totalorder %s47_s22, %s690_s19  ;;  %p696_p7 = scmp.lt.s32.totalorder %s690_s19, %s690_s19 }
  0x2e   :  { %p697_p8 = por %p696_p7, %p695_p6 }
  0x30   :  { %p698_p9 = pnand %p697_p8, %p691_p5 }
  0x32   :  { %701 = shalt.err (!%p698_p9)
}
  0x33   :  { %52 = dma.hbm_to_vmem [thread:$0]  %s923_s3, 2048, %s47_s22, [#allocation6], %s755_s15, %s755_s15, %s756_s16  }
  0x34   :  { %s759_s21 = smov [#allocation8]   ;;  %s702_s26 = scalar_lea.hbm %s925_s5, 2048 }
  0x35   :  { %s60_s23 = sshll.u32 %s759_s21, 4  ;;  %p703_p10 = scmp.ne.s32.totalorder %s925_s5, %s702_s26  ;;  %s61_s23 = int_to_ptr.vmem [resolvable:$true] %s60_s23 }
  0x36   :  { %p706_p11 = scmp.lt.u32.totalorder %s702_s26, %s925_s5 }
  0x38   :  { %p708_p12 = pnand %p706_p11, %p703_p10 }
  0x3a   :  { %711 = shalt.err (!%p708_p12)
}
  0x3b   :  { %s712_s28 = scalar_lea.vmem %s61_s23, 2048  ;;  %p717_p0 = scmp.lt.s32.totalorder %s61_s23, %s61_s23 }
  0x3c   :  { %p713_p13 = scmp.ne.s32.totalorder %s61_s23, %s712_s28  ;;  %p718_p1 = scmp.lt.s32.totalorder %s712_s28, %s712_s28 }
  0x3e   :  { %p719_p2 = por %p718_p1, %p717_p0 }
  0x40   :  { %p720_p3 = pnand %p719_p2, %p713_p13 }
  0x42   :  { %723 = shalt.err (!%p720_p3)
}
  0x43   :  { %66 = dma.hbm_to_vmem [thread:$0]  %s925_s5, 2048, %s61_s23, [#allocation9], %s755_s15, %s755_s15, %s756_s16  }
  0x44   :  { %746 = dma.done.wait [#allocation3], 128  }
  0x45   :  { %747 = vsyncadd [#allocation3], 4294967168 }
  0x46   :  { %748 = dma.done.wait [#allocation6], 4096  }
  0x47   :  { %749 = vsyncadd [#allocation6], 4294963200 }
  0x48   :  { %750 = dma.done.wait [#allocation9], 2048  }
  0x49   :  { %751 = vsyncadd [#allocation9], 4294965248  ;;  %v760_v0 = vmov 0.0|0.0   ;;  %vm761_vm0 = vmmov 0   ;;  %v762_v1 = vmov 0.0   ;;  %v84_v2 = vld [vmem:[#allocation5] sm:$0xff] }
  0x4a   :  { %554 = vmatprep.subr.bf16.mxu0 %v760_v0  ;;  %481 = vmatprep.mubr.msk.f32.mxu0 %vm761_vm0, %v762_v1  ;;  %v85_v3 = vld [vmem:[#allocation5 + $0x8] sm:$0xff]  ;;  %v86_v4 = vld [vmem:[#allocation5 + $0x10] sm:$0xff]  ;;  %v87_v6 = vld [vmem:[#allocation5 + $0x18] sm:$0xff]  ;;  %s763_s13 = smov [#allocation10]  }
  0x4b   :  { %578 = vmatprep.subr.bf16.mxu1 %v760_v0  ;;  %516 = vmatprep.mubr.msk.f32.mxu1 %vm761_vm0, %v762_v1  ;;  %v555_v5 = vpack.c.bf16 %v85_v3, %v84_v2  ;;  %v558_v7 = vpack.c.bf16 %v87_v6, %v86_v4  ;;  %v88_v8 = vld [vmem:[#allocation5 + $0x20] sm:$0xff]  ;;  %v89_v9 = vld [vmem:[#allocation5 + $0x28] sm:$0xff]  ;;  %v181_v12 = vld [vmem:[#allocation7 + $0x10] sm:$0xff]  ;;  %s383_s14 = sshll.u32 %s763_s13, 4  ;;  %s384_s14 = int_to_ptr.vmem [resolvable:$true] %s383_s14 }
  0x4c   :  { %v179_v10 = vld [vmem:[#allocation7] sm:$0xff]  ;;  %v180_v11 = vld [vmem:[#allocation7 + $0x8] sm:$0xff]  ;;  %v182_v13 = vld [vmem:[#allocation7 + $0x18] sm:$0xff]  ;;  %v561_v14 = vpack.c.bf16 %v89_v9, %v88_v8  ;;  %p729_p5 = scmp.lt.s32.totalorder %s384_s14, %s384_s14 }
  0x4d   :  { %556 = vmatpush3.bf16.msra.mxu0 %v555_v5  ;;  %v579_v15 = vpack.c.bf16 %v180_v11, %v179_v10  ;;  %v90_v16 = vld [vmem:[#allocation5 + $0x30] sm:$0xff]  ;;  %v91_v17 = vld [vmem:[#allocation5 + $0x38] sm:$0xff]  ;;  %v582_v18 = vpack.c.bf16 %v182_v13, %v181_v12  ;;  %v183_v19 = vld [vmem:[#allocation7 + $0x20] sm:$0xff] }
  0x4e   :  { %557 = vmatprep.subr.bf16.mxu0 %v760_v0  ;;  %v184_v20 = vld [vmem:[#allocation7 + $0x28] sm:$0xff]  ;;  %v564_v21 = vpack.c.bf16 %v91_v17, %v90_v16  ;;  %v92_v22 = vld [vmem:[#allocation5 + $0x40] sm:$0xff]  ;;  %v185_v25 = vld [vmem:[#allocation7 + $0x30] sm:$0xff] }
  0x4f   :  { %580 = vmatpush3.bf16.msra.mxu1 %v579_v15  ;;  %v93_v23 = vld [vmem:[#allocation5 + $0x48] sm:$0xff]  ;;  %v585_v24 = vpack.c.bf16 %v184_v20, %v183_v19  ;;  %v186_v26 = vld [vmem:[#allocation7 + $0x38] sm:$0xff]  ;;  %v94_v28 = vld [vmem:[#allocation5 + $0x50] sm:$0xff] }
  0x50   :  { %581 = vmatprep.subr.bf16.mxu1 %v760_v0  ;;  %v567_v27 = vpack.c.bf16 %v93_v23, %v92_v22  ;;  %v95_v29 = vld [vmem:[#allocation5 + $0x58] sm:$0xff]  ;;  %v588_v30 = vpack.c.bf16 %v186_v26, %v185_v25  ;;  %v187_v31 = vld [vmem:[#allocation7 + $0x40] sm:$0xff]  ;;  %v188_v32 = vld [vmem:[#allocation7 + $0x48] sm:$0xff] }
  0x51   :  { %559 = vmatpush3.bf16.msra.mxu0 %v558_v7  ;;  %v570_v33 = vpack.c.bf16 %v95_v29, %v94_v28  ;;  %v96_v34 = vld [vmem:[#allocation5 + $0x60] sm:$0xff]  ;;  %v97_v35 = vld [vmem:[#allocation5 + $0x68] sm:$0xff]  ;;  %v591_v36 = vpack.c.bf16 %v188_v32, %v187_v31  ;;  %v189_v37 = vld [vmem:[#allocation7 + $0x50] sm:$0xff] }
  0x52   :  { %560 = vmatprep.subr.bf16.mxu0 %v760_v0  ;;  %v190_v38 = vld [vmem:[#allocation7 + $0x58] sm:$0xff]  ;;  %v573_v39 = vpack.c.bf16 %v97_v35, %v96_v34  ;;  %v98_v40 = vld [vmem:[#allocation5 + $0x70] sm:$0xff]  ;;  %v191_v45 = vld [vmem:[#allocation7 + $0x60] sm:$0xff] }
  0x53   :  { %583 = vmatpush3.bf16.msra.mxu1 %v582_v18  ;;  %v99_v41 = vld [vmem:[#allocation5 + $0x78] sm:$0xff]  ;;  %v594_v42 = vpack.c.bf16 %v190_v38, %v189_v37  ;;  %v192_v46 = vld [vmem:[#allocation7 + $0x68] sm:$0xff]  ;;  %v193_v48 = vld [vmem:[#allocation7 + $0x70] sm:$0xff] }
  0x54   :  { %584 = vmatprep.subr.bf16.mxu1 %v760_v0  ;;  %v576_v43 = vpack.c.bf16 %v99_v41, %v98_v40  ;;  %v83_v44 = vld [vmem:[#allocation2] sm:$0xff]  ;;  %v597_v47 = vpack.c.bf16 %v192_v46, %v191_v45  ;;  %v274_v51 = vld [vmem:[#allocation8] sm:$0xff]  ;;  %v275_v52 = vld [vmem:[#allocation8 + $0x8] sm:$0xff] }
  0x55   :  { %562 = vmatpush3.bf16.msra.mxu0 %v561_v14  ;;  %v194_v49 = vld [vmem:[#allocation7 + $0x78] sm:$0xff]  ;;  %v276_v53 = vld [vmem:[#allocation8 + $0x10] sm:$0xff]  ;;  %v603_v54 = vpack.c.bf16 %v275_v52, %v274_v51  ;;  %v278_v57 = vld [vmem:[#allocation8 + $0x20] sm:$0xff] }
  0x56   :  { %563 = vmatprep.subr.bf16.mxu0 %v760_v0  ;;  %v600_v50 = vpack.c.bf16 %v194_v49, %v193_v48  ;;  %v277_v55 = vld [vmem:[#allocation8 + $0x18] sm:$0xff]  ;;  %v279_v58 = vld [vmem:[#allocation8 + $0x28] sm:$0xff]  ;;  %v280_v60 = vld [vmem:[#allocation8 + $0x30] sm:$0xff] }
  0x57   :  { %586 = vmatpush3.bf16.msra.mxu1 %v585_v24  ;;  %v606_v56 = vpack.c.bf16 %v277_v55, %v276_v53  ;;  %v609_v59 = vpack.c.bf16 %v279_v58, %v278_v57  ;;  %v281_v61 = vld [vmem:[#allocation8 + $0x38] sm:$0xff]  ;;  %v282_v63 = vld [vmem:[#allocation8 + $0x40] sm:$0xff]  ;;  %v284_v3 = vld [vmem:[#allocation8 + $0x50] sm:$0xff] }
  0x58   :  { %587 = vmatprep.subr.bf16.mxu1 %v760_v0  ;;  %v612_v62 = vpack.c.bf16 %v281_v61, %v280_v60  ;;  %v285_v4 = vld [vmem:[#allocation8 + $0x58] sm:$0xff]  ;;  %v286_v12 = vld [vmem:[#allocation8 + $0x60] sm:$0xff]  ;;  %v287_v13 = vld [vmem:[#allocation8 + $0x68] sm:$0xff] }
  0x59   :  { %565 = vmatpush3.bf16.msra.mxu0 %v564_v21  ;;  %v618_v5 = vpack.c.bf16 %v285_v4, %v284_v3  ;;  %v394_v6 = vld [vmem:[%s922_s2] ss:$0 sm:$0xff]  ;;  %v621_v14 = vpack.c.bf16 %v287_v13, %v286_v12  ;;  %v288_v15 = vld [vmem:[#allocation8 + $0x70] sm:$0xff] }
  0x5a   :  { %566 = vmatprep.subr.bf16.mxu0 %v760_v0  ;;  %v289_v16 = vld [vmem:[#allocation8 + $0x78] sm:$0xff] }
  0x5b   :  { %589 = vmatpush3.bf16.msra.mxu1 %v588_v30  ;;  %v624_v17 = vpack.c.bf16 %v289_v16, %v288_v15  ;;  %v395_v18 = vld [vmem:[%s924_s4] ss:$0 sm:$0xff]  ;;  %s724_s4 = scalar_lea.vmem %s384_s14, 128 }
  0x5c   :  { %590 = vmatprep.subr.bf16.mxu1 %v760_v0  ;;  %v396_v24 = vld [vmem:[%s926_s6] ss:$0 sm:$0xff]  ;;  %p725_p4 = scmp.ne.s32.totalorder %s384_s14, %s724_s4  ;;  %p730_p6 = scmp.lt.s32.totalorder %s724_s4, %s724_s4 }
  0x5d   :  { %568 = vmatpush3.bf16.msra.mxu0 %v567_v27 }
  0x5e   :  { %569 = vmatprep.subr.bf16.mxu0 %v760_v0  ;;  %p731_p7 = por %p730_p6, %p729_p5 }
  0x5f   :  { %592 = vmatpush3.bf16.msra.mxu1 %v591_v36 }
  0x60   :  { %593 = vmatprep.subr.bf16.mxu1 %v760_v0  ;;  %p732_p8 = pnand %p731_p7, %p725_p4 }
  0x61   :  { %571 = vmatpush3.bf16.msra.mxu0 %v570_v33 }
  0x62   :  { %572 = vmatprep.subr.bf16.mxu0 %v760_v0 }
  0x63   :  { %595 = vmatpush3.bf16.msra.mxu1 %v594_v42 }
  0x64   :  { %596 = vmatprep.subr.bf16.mxu1 %v760_v0 }
  0x65   :  { %574 = vmatpush3.bf16.msra.mxu0 %v573_v39 }
  0x66   :  { %575 = vmatprep.subr.bf16.mxu0 %v760_v0 }
  0x67   :  { %598 = vmatpush3.bf16.msra.mxu1 %v597_v47 }
  0x68   :  { %599 = vmatprep.subr.bf16.mxu1 %v760_v0 }
  0x69   :  { %577 = vmatpush3.bf16.msra.mxu0 %v576_v43 }
  0x6a   :  { %602 = vmatprep.subr.bf16.mxu0 %v760_v0 }
  0x6b   :  { %601 = vmatpush3.bf16.msra.mxu1 %v600_v50 }
  0x6c   :  { %482 = vmatmul.mubr.f32.vlgmr.msra.gmra.mrb[0].mxu0 %v83_v44 }
  0x6d   :  { %551 = vmatprep.mubr.msk.f32.mxu0 %vm761_vm0, %v762_v1  ;;  %604 = vmatpush3.bf16.msra.mxu0 %v603_v54  ;;  %v283_v1 = vld [vmem:[#allocation8 + $0x48] sm:$0xff] }
  0x6e   :  { %605 = vmatprep.subr.bf16.mxu0 %v760_v0  ;;  %v615_v2 = vpack.c.bf16 %v283_v1, %v282_v63 }
  0x71   :  { %607 = vmatpush3.bf16.msra.mxu0 %v606_v56 }
  0x72   :  { %608 = vmatprep.subr.bf16.mxu0 %v760_v0 }
  0x75   :  { %610 = vmatpush3.bf16.msra.mxu0 %v609_v59 }
  0x76   :  { %611 = vmatprep.subr.bf16.mxu0 %v760_v0 }
  0x79   :  { %613 = vmatpush3.bf16.msra.mxu0 %v612_v62 }
  0x7a   :  { %614 = vmatprep.subr.bf16.mxu0 %v760_v0 }
  0x7d   :  { %616 = vmatpush3.bf16.msra.mxu0 %v615_v2 }
  0x7e   :  { %617 = vmatprep.subr.bf16.mxu0 %v760_v0 }
  0x81   :  { %619 = vmatpush3.bf16.msra.mxu0 %v618_v5 }
  0x82   :  { %620 = vmatprep.subr.bf16.mxu0 %v760_v0 }
  0x85   :  { %622 = vmatpush3.bf16.msra.mxu0 %v621_v14 }
  0x86   :  { %623 = vmatprep.subr.bf16.mxu0 %v760_v0  ;;  %v397_v0 = vld [vmem:[%s927_s7] ss:$0 sm:$0xff] }
  0x89   :  { %625 = vmatpush3.bf16.msra.mxu0 %v624_v17 }
 0x13f   :  { %v173_v7 = vpop.f32.mrb[0].mxu0 }
 0x140   :  { %v174_v8 = vadd.f32 %v394_v6, %v173_v7  ;;  %v483_v9 = vpop.f32.mrb[1].mxu0 }
 0x142   :  { %v177_v10 = vmax.f32 %v174_v8, 0.0 }
 0x144   :  { %v178_v11 = vmin.f32 %v177_v10, 6.0 }
 0x146   :  { %517 = vmatmul.mubr.f32.vlgmr.msra.gmra.mrb[0].mxu1 %v178_v11 }
 0x219   :  { %v268_v19 = vpop.f32.mrb[0].mxu1 }
 0x21a   :  { %v269_v20 = vadd.f32 %v395_v18, %v268_v19  ;;  %v518_v21 = vpop.f32.mrb[1].mxu1 }
 0x21c   :  { %v272_v22 = vmax.f32 %v269_v20, 0.0 }
 0x21e   :  { %v273_v23 = vmin.f32 %v272_v22, 6.0 }
 0x220   :  { %552 = vmatmul.mubr.f32.vlgmr.msra.gmra.mrb[2].mxu0 %v273_v23 }
 0x2f3   :  { %v356_v25 = vpop.f32.mrb[2].mxu0 }
 0x2f4   :  { %v367_v26 = vmul.f32 %v396_v24, %v356_v25  ;;  %v553_v27 = vpop.f32.mrb[3].mxu0 }
 0x2f6   :  { %v375_v28 = vadd.f32 %v397_v0, %v367_v26 }
 0x2f8   :  { %376 = vst [vmem:[#allocation10] sm:$0xff] %v375_v28 }
 0x2f9   :  { %735 = shalt.err (!%p732_p8)
}
 0x2fa   :  { %s736_s18 = scalar_lea.hbm %s928_s8, 128 }
 0x2fb   :  { %p737_p9 = scmp.ne.s32.totalorder %s928_s8, %s736_s18  ;;  %p740_p10 = scmp.lt.u32.totalorder %s736_s18, %s928_s8 }
 0x2fd   :  { %p742_p11 = pnand %p740_p10, %p737_p9 }
 0x2ff   :  { %745 = shalt.err (!%p742_p11)
}
 0x300   :  { %386 = dma.vmem_to_hbm [thread:$0]  %s384_s14, 128, %s928_s8, [#allocation4]  }
 0x301   :  { %752 = dma.done.wait [#allocation4], 128  }
 0x302   :  { %753 = vsyncadd [#allocation4], 4294967168 }
 0x303   :  { %390 = vsyncpa [#allocation3], 1 }
 0x304   :  { %391 = vsyncpa [#allocation6], 1 }
 0x305   :  { %392 = vsyncpa [#allocation9], 1 }
 0x306   :  { %393 = vsyncpa [#allocation4], 1 }

// kernel: tpu_custom_call.1
= control target key start
LH: loop header
LB: loop body
LE: loop exit
PB: predicated region body
PF: predicated region fallthrough
CT: control target
= control target key end

     0   :  { %13 = vsyncpa [#allocation3], 0  ;;  %s920_s0 = inlined_call_operand.hbm [shape: f32[8,128], index: 0, kind: input, shape index: {}]   ;;  %s921_s1 = inlined_call_operand.hbm [shape: f32[128,128], index: 1, kind: input, shape index: {}]   ;;  %s922_s2 = inlined_call_operand.vmem [shape: f32[1,128], index: 2, kind: input, shape index: {}]   ;;  %s923_s3 = inlined_call_operand.hbm [shape: f32[128,128], index: 3, kind: input, shape index: {}]   ;;  %s924_s4 = inlined_call_operand.vmem [shape: f32[1,128], index: 4, kind: input, shape index: {}]   ;;  %s925_s5 = inlined_call_operand.hbm [shape: f32[128,128], index: 5, kind: input, shape index: {}]   ;;  %s926_s6 = inlined_call_operand.vmem [shape: f32[1,128], index: 6, kind: input, shape index: {}]   ;;  %s927_s7 = inlined_call_operand.vmem [shape: f32[1,128], index: 7, kind: input, shape index: {}]   ;;  %s928_s8 = inlined_call_operand.hbm [shape: f32[8,128], index: 8, kind: output, shape index: {}]  }
   0x1   :  { %14 = vsyncpa [#allocation6], 0 }
   0x2   :  { %15 = vsyncpa [#allocation9], 0 }
   0x3   :  { %16 = vsyncpa [#allocation4], 0  ;;  %s754_s27 = smov [#allocation5]   ;;  %s636_s9 = scalar_lea.hbm %s921_s1, 2048 }
   0x4   :  { %s32_s28 = sshll.u32 %s754_s27, 4  ;;  %p637_p0 = scmp.ne.s32.totalorder %s921_s1, %s636_s9  ;;  %s33_s28 = int_to_ptr.vmem [resolvable:$true] %s32_s28 }
   0x5   :  { %p640_p1 = scmp.lt.u32.totalorder %s636_s9, %s921_s1 }
   0x7   :  { %p642_p2 = pnand %p640_p1, %p637_p0 }
   0x9   :  { %645 = shalt.err (!%p642_p2)
}
   0xa   :  { %s646_s14 = scalar_lea.vmem %s33_s28, 2048  ;;  %p651_p4 = scmp.lt.s32.totalorder %s33_s28, %s33_s28 }
   0xb   :  { %p647_p3 = scmp.ne.s32.totalorder %s33_s28, %s646_s14  ;;  %p652_p5 = scmp.lt.s32.totalorder %s646_s14, %s646_s14 }
   0xd   :  { %p653_p6 = por %p652_p5, %p651_p4 }
   0xf   :  { %p654_p7 = pnand %p653_p6, %p647_p3 }
  0x11   :  { %657 = shalt.err (!%p654_p7)
}
  0x12   :  { %s755_s15 = smov 128   ;;  %s756_s16 = smov 8  }
  0x13   :  { %38 = dma.hbm_to_vmem [thread:$0]  %s921_s1, 2048, %s33_s28, [#allocation6], %s755_s15, %s755_s15, %s756_s16  }
  0x14   :  { %s757_s19 = smov [#allocation2]   ;;  %s758_s21 = smov [#allocation7]  }
  0x15   :  { %s23_s20 = sshll.u32 %s757_s19, 4  ;;  %s46_s22 = sshll.u32 %s758_s21, 4  ;;  %s24_s20 = int_to_ptr.vmem [resolvable:$true] %s23_s20  ;;  %s47_s22 = int_to_ptr.vmem [resolvable:$true] %s46_s22 }
  0x16   :  { %s658_s25 = scalar_lea.hbm %s920_s0, 128 }
  0x17   :  { %p659_p8 = scmp.ne.s32.totalorder %s920_s0, %s658_s25  ;;  %p662_p9 = scmp.lt.u32.totalorder %s658_s25, %s920_s0 }
  0x19   :  { %p664_p10 = pnand %p662_p9, %p659_p8 }
  0x1b   :  { %667 = shalt.err (!%p664_p10)
}
  0x1c   :  { %s668_s1 = scalar_lea.vmem %s24_s20, 128  ;;  %p673_p12 = scmp.lt.s32.totalorder %s24_s20, %s24_s20 }
  0x1d   :  { %p669_p11 = scmp.ne.s32.totalorder %s24_s20, %s668_s1  ;;  %p674_p13 = scmp.lt.s32.totalorder %s668_s1, %s668_s1 }
  0x1f   :  { %p675_p0 = por %p674_p13, %p673_p12 }
  0x21   :  { %p676_p1 = pnand %p675_p0, %p669_p11 }
  0x23   :  { %679 = shalt.err (!%p676_p1)
}
  0x24   :  { %26 = dma.hbm_to_vmem [thread:$0]  %s920_s0, 128, %s24_s20, [#allocation3]  }
  0x25   :  { %s680_s12 = scalar_lea.hbm %s923_s3, 2048 }
  0x26   :  { %p681_p2 = scmp.ne.s32.totalorder %s923_s3, %s680_s12  ;;  %p684_p3 = scmp.lt.u32.totalorder %s680_s12, %s923_s3 }
  0x28   :  { %p686_p4 = pnand %p684_p3, %p681_p2 }
  0x2a   :  { %689 = shalt.err (!%p686_p4)
}
  0x2b   :  { %s690_s19 = scalar_lea.vmem %s47_s22, 2048  ;;  %p695_p6 = scmp.lt.s32.totalorder %s47_s22, %s47_s22 }
  0x2c   :  { %p691_p5 = scmp.ne.s32.totalorder %s47_s22, %s690_s19  ;;  %p696_p7 = scmp.lt.s32.totalorder %s690_s19, %s690_s19 }
  0x2e   :  { %p697_p8 = por %p696_p7, %p695_p6 }
  0x30   :  { %p698_p9 = pnand %p697_p8, %p691_p5 }
  0x32   :  { %701 = shalt.err (!%p698_p9)
}
  0x33   :  { %52 = dma.hbm_to_vmem [thread:$0]  %s923_s3, 2048, %s47_s22, [#allocation6], %s755_s15, %s755_s15, %s756_s16  }
  0x34   :  { %s759_s21 = smov [#allocation8]   ;;  %s702_s26 = scalar_lea.hbm %s925_s5, 2048 }
  0x35   :  { %s60_s23 = sshll.u32 %s759_s21, 4  ;;  %p703_p10 = scmp.ne.s32.totalorder %s925_s5, %s702_s26  ;;  %s61_s23 = int_to_ptr.vmem [resolvable:$true] %s60_s23 }
  0x36   :  { %p706_p11 = scmp.lt.u32.totalorder %s702_s26, %s925_s5 }
  0x38   :  { %p708_p12 = pnand %p706_p11, %p703_p10 }
  0x3a   :  { %711 = shalt.err (!%p708_p12)
}
  0x3b   :  { %s712_s28 = scalar_lea.vmem %s61_s23, 2048  ;;  %p717_p0 = scmp.lt.s32.totalorder %s61_s23, %s61_s23 }
  0x3c   :  { %p713_p13 = scmp.ne.s32.totalorder %s61_s23, %s712_s28  ;;  %p718_p1 = scmp.lt.s32.totalorder %s712_s28, %s712_s28 }
  0x3e   :  { %p719_p2 = por %p718_p1, %p717_p0 }
  0x40   :  { %p720_p3 = pnand %p719_p2, %p713_p13 }
  0x42   :  { %723 = shalt.err (!%p720_p3)
}
  0x43   :  { %66 = dma.hbm_to_vmem [thread:$0]  %s925_s5, 2048, %s61_s23, [#allocation9], %s755_s15, %s755_s15, %s756_s16  }
  0x44   :  { %746 = dma.done.wait [#allocation3], 128  }
  0x45   :  { %747 = vsyncadd [#allocation3], 4294967168 }
  0x46   :  { %748 = dma.done.wait [#allocation6], 4096  }
  0x47   :  { %749 = vsyncadd [#allocation6], 4294963200 }
  0x48   :  { %750 = dma.done.wait [#allocation9], 2048  }
  0x49   :  { %751 = vsyncadd [#allocation9], 4294965248  ;;  %v760_v0 = vmov 0.0|0.0   ;;  %vm761_vm0 = vmmov 0   ;;  %v762_v1 = vmov 0.0   ;;  %v84_v2 = vld [vmem:[#allocation5] sm:$0xff] }
  0x4a   :  { %554 = vmatprep.subr.bf16.mxu0 %v760_v0  ;;  %481 = vmatprep.mubr.msk.f32.mxu0 %vm761_vm0, %v762_v1  ;;  %v85_v3 = vld [vmem:[#allocation5 + $0x8] sm:$0xff]  ;;  %v86_v4 = vld [vmem:[#allocation5 + $0x10] sm:$0xff]  ;;  %v87_v6 = vld [vmem:[#allocation5 + $0x18] sm:$0xff]  ;;  %s763_s13 = smov [#allocation10]  }
  0x4b   :  { %578 = vmatprep.subr.bf16.mxu1 %v760_v0  ;;  %516 = vmatprep.mubr.msk.f32.mxu1 %vm761_vm0, %v762_v1  ;;  %v555_v5 = vpack.c.bf16 %v85_v3, %v84_v2  ;;  %v558_v7 = vpack.c.bf16 %v87_v6, %v86_v4  ;;  %v88_v8 = vld [vmem:[#allocation5 + $0x20] sm:$0xff]  ;;  %v89_v9 = vld [vmem:[#allocation5 + $0x28] sm:$0xff]  ;;  %v181_v12 = vld [vmem:[#allocation7 + $0x10] sm:$0xff]  ;;  %s383_s14 = sshll.u32 %s763_s13, 4  ;;  %s384_s14 = int_to_ptr.vmem [resolvable:$true] %s383_s14 }
  0x4c   :  { %v179_v10 = vld [vmem:[#allocation7] sm:$0xff]  ;;  %v180_v11 = vld [vmem:[#allocation7 + $0x8] sm:$0xff]  ;;  %v182_v13 = vld [vmem:[#allocation7 + $0x18] sm:$0xff]  ;;  %v561_v14 = vpack.c.bf16 %v89_v9, %v88_v8  ;;  %p729_p5 = scmp.lt.s32.totalorder %s384_s14, %s384_s14 }
  0x4d   :  { %556 = vmatpush3.bf16.msra.mxu0 %v555_v5  ;;  %v579_v15 = vpack.c.bf16 %v180_v11, %v179_v10  ;;  %v90_v16 = vld [vmem:[#allocation5 + $0x30] sm:$0xff]  ;;  %v91_v17 = vld [vmem:[#allocation5 + $0x38] sm:$0xff]  ;;  %v582_v18 = vpack.c.bf16 %v182_v13, %v181_v12  ;;  %v183_v19 = vld [vmem:[#allocation7 + $0x20] sm:$0xff] }
  0x4e   :  { %557 = vmatprep.subr.bf16.mxu0 %v760_v0  ;;  %v184_v20 = vld [vmem:[#allocation7 + $0x28] sm:$0xff]  ;;  %v564_v21 = vpack.c.bf16 %v91_v17, %v90_v16  ;;  %v92_v22 = vld [vmem:[#allocation5 + $0x40] sm:$0xff]  ;;  %v185_v25 = vld [vmem:[#allocation7 + $0x30] sm:$0xff] }
  0x4f   :  { %580 = vmatpush3.bf16.msra.mxu1 %v579_v15  ;;  %v93_v23 = vld [vmem:[#allocation5 + $0x48] sm:$0xff]  ;;  %v585_v24 = vpack.c.bf16 %v184_v20, %v183_v19  ;;  %v186_v26 = vld [vmem:[#allocation7 + $0x38] sm:$0xff]  ;;  %v94_v28 = vld [vmem:[#allocation5 + $0x50] sm:$0xff] }
  0x50   :  { %581 = vmatprep.subr.bf16.mxu1 %v760_v0  ;;  %v567_v27 = vpack.c.bf16 %v93_v23, %v92_v22  ;;  %v95_v29 = vld [vmem:[#allocation5 + $0x58] sm:$0xff]  ;;  %v588_v30 = vpack.c.bf16 %v186_v26, %v185_v25  ;;  %v187_v31 = vld [vmem:[#allocation7 + $0x40] sm:$0xff]  ;;  %v188_v32 = vld [vmem:[#allocation7 + $0x48] sm:$0xff] }
  0x51   :  { %559 = vmatpush3.bf16.msra.mxu0 %v558_v7  ;;  %v570_v33 = vpack.c.bf16 %v95_v29, %v94_v28  ;;  %v96_v34 = vld [vmem:[#allocation5 + $0x60] sm:$0xff]  ;;  %v97_v35 = vld [vmem:[#allocation5 + $0x68] sm:$0xff]  ;;  %v591_v36 = vpack.c.bf16 %v188_v32, %v187_v31  ;;  %v189_v37 = vld [vmem:[#allocation7 + $0x50] sm:$0xff] }
  0x52   :  { %560 = vmatprep.subr.bf16.mxu0 %v760_v0  ;;  %v190_v38 = vld [vmem:[#allocation7 + $0x58] sm:$0xff]  ;;  %v573_v39 = vpack.c.bf16 %v97_v35, %v96_v34  ;;  %v98_v40 = vld [vmem:[#allocation5 + $0x70] sm:$0xff]  ;;  %v191_v45 = vld [vmem:[#allocation7 + $0x60] sm:$0xff] }
  0x53   :  { %583 = vmatpush3.bf16.msra.mxu1 %v582_v18  ;;  %v99_v41 = vld [vmem:[#allocation5 + $0x78] sm:$0xff]  ;;  %v594_v42 = vpack.c.bf16 %v190_v38, %v189_v37  ;;  %v192_v46 = vld [vmem:[#allocation7 + $0x68] sm:$0xff]  ;;  %v193_v48 = vld [vmem:[#allocation7 + $0x70] sm:$0xff] }
  0x54   :  { %584 = vmatprep.subr.bf16.mxu1 %v760_v0  ;;  %v576_v43 = vpack.c.bf16 %v99_v41, %v98_v40  ;;  %v83_v44 = vld [vmem:[#allocation2] sm:$0xff]  ;;  %v597_v47 = vpack.c.bf16 %v192_v46, %v191_v45  ;;  %v274_v51 = vld [vmem:[#allocation8] sm:$0xff]  ;;  %v275_v52 = vld [vmem:[#allocation8 + $0x8] sm:$0xff] }
  0x55   :  { %562 = vmatpush3.bf16.msra.mxu0 %v561_v14  ;;  %v194_v49 = vld [vmem:[#allocation7 + $0x78] sm:$0xff]  ;;  %v276_v53 = vld [vmem:[#allocation8 + $0x10] sm:$0xff]  ;;  %v603_v54 = vpack.c.bf16 %v275_v52, %v274_v51  ;;  %v278_v57 = vld [vmem:[#allocation8 + $0x20] sm:$0xff] }
  0x56   :  { %563 = vmatprep.subr.bf16.mxu0 %v760_v0  ;;  %v600_v50 = vpack.c.bf16 %v194_v49, %v193_v48  ;;  %v277_v55 = vld [vmem:[#allocation8 + $0x18] sm:$0xff]  ;;  %v279_v58 = vld [vmem:[#allocation8 + $0x28] sm:$0xff]  ;;  %v280_v60 = vld [vmem:[#allocation8 + $0x30] sm:$0xff] }
  0x57   :  { %586 = vmatpush3.bf16.msra.mxu1 %v585_v24  ;;  %v606_v56 = vpack.c.bf16 %v277_v55, %v276_v53  ;;  %v609_v59 = vpack.c.bf16 %v279_v58, %v278_v57  ;;  %v281_v61 = vld [vmem:[#allocation8 + $0x38] sm:$0xff]  ;;  %v282_v63 = vld [vmem:[#allocation8 + $0x40] sm:$0xff]  ;;  %v284_v3 = vld [vmem:[#allocation8 + $0x50] sm:$0xff] }
  0x58   :  { %587 = vmatprep.subr.bf16.mxu1 %v760_v0  ;;  %v612_v62 = vpack.c.bf16 %v281_v61, %v280_v60  ;;  %v285_v4 = vld [vmem:[#allocation8 + $0x58] sm:$0xff]  ;;  %v286_v12 = vld [vmem:[#allocation8 + $0x60] sm:$0xff]  ;;  %v287_v13 = vld [vmem:[#allocation8 + $0x68] sm:$0xff] }
  0x59   :  { %565 = vmatpush3.bf16.msra.mxu0 %v564_v21  ;;  %v618_v5 = vpack.c.bf16 %v285_v4, %v284_v3  ;;  %v394_v6 = vld [vmem:[%s922_s2] ss:$0 sm:$0xff]  ;;  %v621_v14 = vpack.c.bf16 %v287_v13, %v286_v12  ;;  %v288_v15 = vld [vmem:[#allocation8 + $0x70] sm:$0xff] }
  0x5a   :  { %566 = vmatprep.subr.bf16.mxu0 %v760_v0  ;;  %v289_v16 = vld [vmem:[#allocation8 + $0x78] sm:$0xff] }
  0x5b   :  { %589 = vmatpush3.bf16.msra.mxu1 %v588_v30  ;;  %v624_v17 = vpack.c.bf16 %v289_v16, %v288_v15  ;;  %v395_v18 = vld [vmem:[%s924_s4] ss:$0 sm:$0xff]  ;;  %s724_s4 = scalar_lea.vmem %s384_s14, 128 }
  0x5c   :  { %590 = vmatprep.subr.bf16.mxu1 %v760_v0  ;;  %v396_v24 = vld [vmem:[%s926_s6] ss:$0 sm:$0xff]  ;;  %p725_p4 = scmp.ne.s32.totalorder %s384_s14, %s724_s4  ;;  %p730_p6 = scmp.lt.s32.totalorder %s724_s4, %s724_s4 }
  0x5d   :  { %568 = vmatpush3.bf16.msra.mxu0 %v567_v27 }
  0x5e   :  { %569 = vmatprep.subr.bf16.mxu0 %v760_v0  ;;  %p731_p7 = por %p730_p6, %p729_p5 }
  0x5f   :  { %592 = vmatpush3.bf16.msra.mxu1 %v591_v36 }
  0x60   :  { %593 = vmatprep.subr.bf16.mxu1 %v760_v0  ;;  %p732_p8 = pnand %p731_p7, %p725_p4 }
  0x61   :  { %571 = vmatpush3.bf16.msra.mxu0 %v570_v33 }
  0x62   :  { %572 = vmatprep.subr.bf16.mxu0 %v760_v0 }
  0x63   :  { %595 = vmatpush3.bf16.msra.mxu1 %v594_v42 }
  0x64   :  { %596 = vmatprep.subr.bf16.mxu1 %v760_v0 }
  0x65   :  { %574 = vmatpush3.bf16.msra.mxu0 %v573_v39 }
  0x66   :  { %575 = vmatprep.subr.bf16.mxu0 %v760_v0 }
  0x67   :  { %598 = vmatpush3.bf16.msra.mxu1 %v597_v47 }
  0x68   :  { %599 = vmatprep.subr.bf16.mxu1 %v760_v0 }
  0x69   :  { %577 = vmatpush3.bf16.msra.mxu0 %v576_v43 }
  0x6a   :  { %602 = vmatprep.subr.bf16.mxu0 %v760_v0 }
  0x6b   :  { %601 = vmatpush3.bf16.msra.mxu1 %v600_v50 }
  0x6c   :  { %482 = vmatmul.mubr.f32.vlgmr.msra.gmra.mrb[0].mxu0 %v83_v44 }
  0x6d   :  { %551 = vmatprep.mubr.msk.f32.mxu0 %vm761_vm0, %v762_v1  ;;  %604 = vmatpush3.bf16.msra.mxu0 %v603_v54  ;;  %v283_v1 = vld [vmem:[#allocation8 + $0x48] sm:$0xff] }
  0x6e   :  { %605 = vmatprep.subr.bf16.mxu0 %v760_v0  ;;  %v615_v2 = vpack.c.bf16 %v283_v1, %v282_v63 }
  0x71   :  { %607 = vmatpush3.bf16.msra.mxu0 %v606_v56 }
  0x72   :  { %608 = vmatprep.subr.bf16.mxu0 %v760_v0 }
  0x75   :  { %610 = vmatpush3.bf16.msra.mxu0 %v609_v59 }
  0x76   :  { %611 = vmatprep.subr.bf16.mxu0 %v760_v0 }
  0x79   :  { %613 = vmatpush3.bf16.msra.mxu0 %v612_v62 }
  0x7a   :  { %614 = vmatprep.subr.bf16.mxu0 %v760_v0 }
  0x7d   :  { %616 = vmatpush3.bf16.msra.mxu0 %v615_v2 }
  0x7e   :  { %617 = vmatprep.subr.bf16.mxu0 %v760_v0 }
  0x81   :  { %619 = vmatpush3.bf16.msra.mxu0 %v618_v5 }
  0x82   :  { %620 = vmatprep.subr.bf16.mxu0 %v760_v0 }
  0x85   :  { %622 = vmatpush3.bf16.msra.mxu0 %v621_v14 }
  0x86   :  { %623 = vmatprep.subr.bf16.mxu0 %v760_v0  ;;  %v397_v0 = vld [vmem:[%s927_s7] ss:$0 sm:$0xff] }
  0x89   :  { %625 = vmatpush3.bf16.msra.mxu0 %v624_v17 }
 0x13f   :  { %v173_v7 = vpop.f32.mrb[0].mxu0 }
 0x140   :  { %v174_v8 = vadd.f32 %v394_v6, %v173_v7  ;;  %v483_v9 = vpop.f32.mrb[1].mxu0 }
 0x142   :  { %v177_v10 = vmax.f32 %v174_v8, 0.0 }
 0x144   :  { %v178_v11 = vmin.f32 %v177_v10, 6.0 }
 0x146   :  { %517 = vmatmul.mubr.f32.vlgmr.msra.gmra.mrb[0].mxu1 %v178_v11 }
 0x219   :  { %v268_v19 = vpop.f32.mrb[0].mxu1 }
 0x21a   :  { %v269_v20 = vadd.f32 %v395_v18, %v268_v19  ;;  %v518_v21 = vpop.f32.mrb[1].mxu1 }
 0x21c   :  { %v272_v22 = vmax.f32 %v269_v20, 0.0 }
 0x21e   :  { %v273_v23 = vmin.f32 %v272_v22, 6.0 }
 0x220   :  { %552 = vmatmul.mubr.f32.vlgmr.msra.gmra.mrb[2].mxu0 %v273_v23 }
 0x2f3   :  { %v356_v25 = vpop.f32.mrb[2].mxu0 }
 0x2f4   :  { %v367_v26 = vmul.f32 %v396_v24, %v356_v25  ;;  %v553_v27 = vpop.f32.mrb[3].mxu0 }
 0x2f6   :  { %v375_v28 = vadd.f32 %v397_v0, %v367_v26 }
 0x2f8   :  { %376 = vst [vmem:[#allocation10] sm:$0xff] %v375_v28 }
 0x2f9   :  { %735 = shalt.err (!%p732_p8)
}
 0x2fa   :  { %s736_s18 = scalar_lea.hbm %s928_s8, 128 }
 0x2fb   :  { %p737_p9 = scmp.ne.s32.totalorder %s928_s8, %s736_s18  ;;  %p740_p10 = scmp.lt.u32.totalorder %s736_s18, %s928_s8 }
 0x2fd   :  { %p742_p11 = pnand %p740_p10, %p737_p9 }
 0x2ff   :  { %745 = shalt.err (!%p742_p11)
}
 0x300   :  { %386 = dma.vmem_to_hbm [thread:$0]  %s384_s14, 128, %s928_s8, [#allocation4]  }
 0x301   :  { %752 = dma.done.wait [#allocation4], 128  }
 0x302   :  { %753 = vsyncadd [#allocation4], 4294967168 }
 0x303   :  { %390 = vsyncpa [#allocation3], 1 }
 0x304   :  { %391 = vsyncpa [#allocation6], 1 }
 0x305   :  { %392 = vsyncpa [#allocation9], 1 }
 0x306   :  { %393 = vsyncpa [#allocation4], 1 }

</bundles_post_ra>
